<compile_context>
chip_gen: v6e
topology: v6e:2x2x1
jax: 0.10.0
libtpu: 0.0.40
codegen_flags: <defaults>
</compile_context>

<pallas_src>
import jax
import jax.numpy as jnp
import numpy as np
from jax.experimental import pallas as pl
from jax.experimental.pallas import tpu as pltpu


def _round_up(v, m):
    return ((v + m - 1) // m) * m


def _se_kernel(x_ref, w1_ref, b1_ref, w2_ref, b2_ref, o_ref):
    # x_ref: [Nb, C, TL] (channels on sublanes, spatial pixels on lanes).
    # Weights/biases are loop-invariant; load once.
    w1 = w1_ref[...]          # [Cmid, C]
    b1 = b1_ref[...]          # [Cmid, 1] f32
    w2 = w2_ref[...]          # [C, Cmid]
    b2 = b2_ref[...]          # [C, 1]    f32
    nb = x_ref.shape[0]
    for b in range(nb):       # static unroll, nb <= 16
        x = x_ref[b]          # [C, TL]
        # conv1x1 #1: [Cmid, C] @ [C, TL] -> [Cmid, TL], f32 accumulate.
        h = jnp.dot(w1, x, preferred_element_type=jnp.float32)
        h = jnp.maximum(h + b1, 0.0)
        # conv1x1 #2: keep the streaming dtype on the MXU (bf16 stays bf16).
        y = jnp.dot(w2, h.astype(w2.dtype),
                    preferred_element_type=jnp.float32) + b2
        o_ref[b] = y.astype(o_ref.dtype)


def squeeze_and_excitation_block(x_nchw, w1, b1, w2, b2, *,
                                 target_tile_bytes=2 * 1024 * 1024):
    """x_nchw: [N, C, H, W]; w1: [Cmid, C, 1, 1]; b1: [Cmid];
    w2: [C, Cmid, 1, 1]; b2: [C].  Returns [N, C, H, W]."""
    N, C, H, W = x_nchw.shape
    Cmid = w1.shape[0]
    L = H * W
    itemsize = jnp.dtype(x_nchw.dtype).itemsize

    # NCHW stays NCHW: view as [N, C, L] (layout-free reshape, no transpose).
    x3d = x_nchw.reshape(N, C, L)

    # Weights as channel matmuls (weights on the LHS), streamed once and kept
    # resident in VMEM across the whole grid.  Biases in f32 (accumulator dtype).
    w1m = w1.reshape(Cmid, C).astype(x_nchw.dtype)     # [Cmid, C]
    w2m = w2.reshape(C, Cmid).astype(x_nchw.dtype)     # [C, Cmid]
    b1m = b1.reshape(Cmid, 1).astype(jnp.float32)
    b2m = b2.reshape(C, 1).astype(jnp.float32)

    slab_bytes = C * L * itemsize   # one batch's [C, L] slab

    if slab_bytes > target_tile_bytes:
        # ---- Large-spatial path: Nb = 1, tile the lane (spatial) axis. ----
        nb = 1
        tl = min(L, _round_up(max(target_tile_bytes // (C * itemsize), 128), 128))
        # Keep enough grid steps to feed v7x's two TensorCores / the pipeline.
        while N * pl.cdiv(L, tl) < 4 and tl > 512:
            tl = _round_up(pl.cdiv(tl, 2), 128)
        # Balance ragged tiles: near-equal, lane-dense (multiple of 128) tiles,
        # avoiding a nearly-empty masked last step.
        if L > tl:
            n_tiles = pl.cdiv(L, tl)
            tl = min(L, _round_up(pl.cdiv(L, n_tiles), 128))
    else:
        # ---- Small-spatial path: whole [C, L] slab; block batches per step. ----
        tl = L
        nb_target = max(1, target_tile_bytes // max(slab_bytes, 1))
        nb_steps_cap = max(1, N // 4)       # keep >= 4 steps when batch allows
        nb = int(max(1, min(nb_target, nb_steps_cap, N, 16)))  # 16 bounds unroll

    grid = (pl.cdiv(N, nb), pl.cdiv(L, tl))

    # Explicit VMEM budget: 2x double-buffered activation tiles (in + out)
    # plus (double-buffered) weights and a little internal scratch headroom.
    x_tile_bytes = nb * C * tl * itemsize
    weight_bytes = 2 * C * Cmid * itemsize + (Cmid + C) * 4
    working_set = 2 * (2 * x_tile_bytes) + 2 * weight_bytes + (1 << 20)
    vmem_limit = int(min(max(2 * working_set, 32 * 1024 * 1024),
                         64 * 1024 * 1024))

    cost = pl.CostEstimate(
        flops=4 * N * L * C * Cmid,                       # two matmuls
        transcendentals=0,
        bytes_accessed=2 * N * C * L * itemsize + weight_bytes,
    )

    out3d = pl.pallas_call(
        _se_kernel,
        out_shape=jax.ShapeDtypeStruct((N, C, L), x_nchw.dtype),
        grid_spec=pltpu.PrefetchScalarGridSpec(
            num_scalar_prefetch=0,
            grid=grid,
            in_specs=[
                pl.BlockSpec((nb, C, tl), lambda n, l: (n, 0, l)),   # x tile
                pl.BlockSpec((Cmid, C), lambda n, l: (0, 0)),        # W1 (resident)
                pl.BlockSpec((Cmid, 1), lambda n, l: (0, 0)),        # b1
                pl.BlockSpec((C, Cmid), lambda n, l: (0, 0)),        # W2 (resident)
                pl.BlockSpec((C, 1), lambda n, l: (0, 0)),           # b2
            ],
            out_specs=pl.BlockSpec((nb, C, tl), lambda n, l: (n, 0, l)),
        ),
        compiler_params=pltpu.CompilerParams(
            dimension_semantics=("parallel", "parallel"),
            vmem_limit_bytes=vmem_limit,
        ),
        cost_estimate=cost,
    )(x3d, w1m, b1m, w2m, b2m)

    # [N, C, L] -> [N, C, H, W] is also a free reshape.
    return out3d.reshape(N, C, H, W)


def _reference(x_nchw, w1, b1, w2, b2):
    N, C, H, W = x_nchw.shape
    Cmid = w1.shape[0]
    xf = x_nchw.astype(jnp.float32).reshape(N, C, H * W)
    w1m = w1.reshape(Cmid, C).astype(jnp.float32)
    w2m = w2.reshape(C, Cmid).astype(jnp.float32)
    h = jnp.maximum(jnp.einsum('oc,ncl->nol', w1m, xf)
                    + b1.astype(jnp.float32)[None, :, None], 0.0)
    y = (jnp.einsum('om,nml->nol', w2m, h)
         + b2.astype(jnp.float32)[None, :, None])
    return y.reshape(N, C, H, W).astype(x_nchw.dtype)


if __name__ == "__main__":
    # channel=64, reduction=16 -> mid channels = 4  (matches the PyTorch module)
    N, C, H, W = 2, 64, 8, 8
    reduction = 16
    Cmid = C // reduction

    key = jax.random.PRNGKey(0)
    kx, k1, k2, k3, k4 = jax.random.split(key, 5)

    x = jax.random.normal(kx, (N, C, H, W), dtype=jnp.float32)
    # PyTorch Conv2d 1x1 parameter shapes
    w1 = jax.random.normal(k1, (Cmid, C, 1, 1), dtype=jnp.float32) * 0.1
    b1 = jax.random.normal(k2, (Cmid,), dtype=jnp.float32) * 0.1
    w2 = jax.random.normal(k3, (C, Cmid, 1, 1), dtype=jnp.float32) * 0.1
    b2 = jax.random.normal(k4, (C,), dtype=jnp.float32) * 0.1

    # 1) Small-spatial path (L = 64 < 128): batch-blocked grid.
    out = jax.block_until_ready(squeeze_and_excitation_block(x, w1, b1, w2, b2))
    ref = _reference(x, w1, b1, w2, b2)
    np.testing.assert_allclose(np.asarray(out), np.asarray(ref),
                               rtol=1e-5, atol=1e-5)

    # 2) Large-spatial path (L = 20480): adaptive, balanced lane tiling.
    x2 = jax.random.normal(kx, (1, 64, 128, 160), dtype=jnp.float32)
    out2 = jax.block_until_ready(squeeze_and_excitation_block(x2, w1, b1, w2, b2))
    ref2 = _reference(x2, w1, b1, w2, b2)
    np.testing.assert_allclose(np.asarray(out2), np.asarray(ref2),
                               rtol=1e-4, atol=1e-4)

    # 3) bf16 streaming path (second matmul in bf16 -> relaxed tolerance).
    xb = x.astype(jnp.bfloat16)
    outb = jax.block_until_ready(squeeze_and_excitation_block(xb, w1, b1, w2, b2))
    refb = _reference(xb, w1, b1, w2, b2)
    np.testing.assert_allclose(np.asarray(outb).astype(np.float32),
                               np.asarray(refb).astype(np.float32),
                               rtol=1e-1, atol=1e-1)

    print("KERNEL_OK")
</pallas_src>

<mosaic_0001>
module attributes {stable_mosaic.version = 11 : i64} {
  func.func @_se_kernel(%arg0: i32, %arg1: i32, %arg2: memref<1x64x64xf32, #tpu.memory_space<vmem>>, %arg3: memref<4x64xf32, #tpu.memory_space<vmem>>, %arg4: memref<4x1xf32, #tpu.memory_space<vmem>>, %arg5: memref<64x4xf32, #tpu.memory_space<vmem>>, %arg6: memref<64x1xf32, #tpu.memory_space<vmem>>, %arg7: memref<1x64x64xf32, #tpu.memory_space<vmem>>) attributes {dimension_semantics = [#tpu.dimension_semantics<parallel>, #tpu.dimension_semantics<parallel>], iteration_bounds = array<i64: 2, 1>, scalar_prefetch = 0 : i64, scratch_operands = 0 : i64, tpu.core_type = #tpu.core_type<tc>, window_params = [{transform_indices = @transform_0, window_bounds = array<i64: 1, 64, 64>}, {pipeline_mode = #tpu.pipeline_mode<synchronous>, transform_indices = @transform_1, window_bounds = array<i64: 4, 64>}, {pipeline_mode = #tpu.pipeline_mode<synchronous>, transform_indices = @transform_2, window_bounds = array<i64: 4, 1>}, {pipeline_mode = #tpu.pipeline_mode<synchronous>, transform_indices = @transform_3, window_bounds = array<i64: 64, 4>}, {pipeline_mode = #tpu.pipeline_mode<synchronous>, transform_indices = @transform_4, window_bounds = array<i64: 64, 1>}, {transform_indices = @transform_5, window_bounds = array<i64: 1, 64, 64>}]} {
    %c0 = arith.constant 0 : index
    %c0_0 = arith.constant 0 : index
    %0 = vector.load %arg3[%c0, %c0_0] : memref<4x64xf32, #tpu.memory_space<vmem>>, vector<4x64xf32>
    %c0_1 = arith.constant 0 : index
    %c0_2 = arith.constant 0 : index
    %1 = vector.load %arg4[%c0_1, %c0_2] : memref<4x1xf32, #tpu.memory_space<vmem>>, vector<4x1xf32>
    %c0_3 = arith.constant 0 : index
    %c0_4 = arith.constant 0 : index
    %2 = vector.load %arg5[%c0_3, %c0_4] : memref<64x4xf32, #tpu.memory_space<vmem>>, vector<64x4xf32>
    %c0_5 = arith.constant 0 : index
    %c0_6 = arith.constant 0 : index
    %3 = vector.load %arg6[%c0_5, %c0_6] : memref<64x1xf32, #tpu.memory_space<vmem>>, vector<64x1xf32>
    %c0_7 = arith.constant 0 : index
    %c0_8 = arith.constant 0 : index
    %c0_9 = arith.constant 0 : index
    %4 = vector.load %arg2[%c0_7, %c0_8, %c0_9] : memref<1x64x64xf32, #tpu.memory_space<vmem>>, vector<1x64x64xf32>
    %5 = vector.shape_cast %4 : vector<1x64x64xf32> to vector<64x64xf32>
    %cst = arith.constant dense<0.000000e+00> : vector<4x64xf32>
    %6 = tpu.matmul %0, %5, %cst {dimension_numbers = #tpu.dot_dimension_numbers<[1], [0], [0], [1], [0, 0, 1, 1], [], []>} : vector<4x64xf32>, vector<64x64xf32>, vector<4x64xf32> -> vector<4x64xf32>
    %7 = vector.broadcast %1 : vector<4x1xf32> to vector<4x64xf32>
    %8 = arith.addf %6, %7 : vector<4x64xf32>
    %cst_10 = arith.constant 0.000000e+00 : f32
    %9 = vector.broadcast %cst_10 : f32 to vector<4x64xf32>
    %10 = arith.maximumf %8, %9 : vector<4x64xf32>
    %cst_11 = arith.constant dense<0.000000e+00> : vector<64x64xf32>
    %11 = tpu.matmul %2, %10, %cst_11 {dimension_numbers = #tpu.dot_dimension_numbers<[1], [0], [0], [1], [0, 0, 1, 1], [], []>} : vector<64x4xf32>, vector<4x64xf32>, vector<64x64xf32> -> vector<64x64xf32>
    %12 = vector.broadcast %3 : vector<64x1xf32> to vector<64x64xf32>
    %13 = arith.addf %11, %12 : vector<64x64xf32>
    %c0_12 = arith.constant 0 : index
    %c0_13 = arith.constant 0 : index
    %c0_14 = arith.constant 0 : index
    %14 = vector.load %arg7[%c0_12, %c0_13, %c0_14] : memref<1x64x64xf32, #tpu.memory_space<vmem>>, vector<1x64x64xf32>
    %15 = vector.shape_cast %14 : vector<1x64x64xf32> to vector<64x64xf32>
    %16 = vector.shape_cast %13 : vector<64x64xf32> to vector<1x64x64xf32>
    tpu.vector_store %arg7[%c0_12, %c0_13, %c0_14], %16 {strides = array<i32>} : memref<1x64x64xf32, #tpu.memory_space<vmem>>, vector<1x64x64xf32>,
    return
  }
  func.func @transform_0(%arg0: i32, %arg1: i32) -> (i32, i32, i32) {
    %c0_i32 = arith.constant 0 : i32
    %c0_i32_0 = arith.constant 0 : i32
    return %arg0, %c0_i32, %arg1 : i32, i32, i32
  }
  func.func @transform_1(%arg0: i32, %arg1: i32) -> (i32, i32) {
    %c0_i32 = arith.constant 0 : i32
    %c0_i32_0 = arith.constant 0 : i32
    %c0_i32_1 = arith.constant 0 : i32
    return %c0_i32, %c0_i32_0 : i32, i32
  }
  func.func @transform_2(%arg0: i32, %arg1: i32) -> (i32, i32) {
    %c0_i32 = arith.constant 0 : i32
    %c0_i32_0 = arith.constant 0 : i32
    %c0_i32_1 = arith.constant 0 : i32
    return %c0_i32, %c0_i32_0 : i32, i32
  }
  func.func @transform_3(%arg0: i32, %arg1: i32) -> (i32, i32) {
    %c0_i32 = arith.constant 0 : i32
    %c0_i32_0 = arith.constant 0 : i32
    %c0_i32_1 = arith.constant 0 : i32
    return %c0_i32, %c0_i32_0 : i32, i32
  }
  func.func @transform_4(%arg0: i32, %arg1: i32) -> (i32, i32) {
    %c0_i32 = arith.constant 0 : i32
    %c0_i32_0 = arith.constant 0 : i32
    %c0_i32_1 = arith.constant 0 : i32
    return %c0_i32, %c0_i32_0 : i32, i32
  }
  func.func @transform_5(%arg0: i32, %arg1: i32) -> (i32, i32, i32) {
    %c0_i32 = arith.constant 0 : i32
    %c0_i32_0 = arith.constant 0 : i32
    return %arg0, %c0_i32, %arg1 : i32, i32, i32
  }
}

</mosaic_0001>

<bundles_post_ra>
// kernel: tpu_custom_call.1
= control target key start
LH: loop header
LB: loop body
LE: loop exit
PB: predicated region body
PF: predicated region fallthrough
CT: control target
= control target key end

     0   :  { %10 = vsyncpa [#allocation3], 0  ;;  %s1070_s0 = inlined_call_operand.vmem [shape: f32[2,64,64], index: 0, kind: input, shape index: {}]   ;;  %s1071_s1 = inlined_call_operand.vmem [shape: f32[4,64], index: 1, kind: input, shape index: {}]   ;;  %s1072_s2 = inlined_call_operand.vmem [shape: f32[4,1], index: 2, kind: input, shape index: {}]   ;;  %s1073_s3 = inlined_call_operand.vmem [shape: f32[64,4], index: 3, kind: input, shape index: {}]   ;;  %s1074_s4 = inlined_call_operand.vmem [shape: f32[64,1], index: 4, kind: input, shape index: {}]   ;;  %s1075_s5 = inlined_call_operand.hbm [shape: f32[2,64,64], index: 5, kind: output, shape index: {}]  }
   0x1   :  { %12 = vsyncpa [#allocation3 + $0x1], 0  ;;  %s881_s18 = smov 0   ;;  %s883_s19 = smov 0  }
   0x2   :  { %s885_s20 = smov 0   ;;  %s887_s21 = smov 0  }
   0x3   :  { %s889_s22 = smov 0   ;;  %s891_s23 = smov 0  }
   0x4 LB: > { %s629_s24 = sadd.s32 4294967295, %s843_s23   ;;  %s630_s25 = sadd.s32 4294967294, %s843_s23   ;;  %s843_s23 = sphi %s891_s23, %s18_s23   ;;  %s839_s22 = sphi %s889_s22, %s1082_s22   ;;  %s835_s21 = sphi %s887_s21, %s1081_s21   ;;  %s831_s20 = sphi %s885_s20, %s1080_s20   ;;  %s827_s19 = sphi %s883_s19, %s1079_s19   ;;  %s823_s18 = sphi %s881_s18, %s1078_s18  }
   0x5   : > { %s30_s26 = sadd.s32 1, %s839_s22  ;;  %s151_s27 = sadd.s32 1, %s831_s20 }
   0x6   : > { %p32_p0 = scmp.ge.s32.totalorder %s30_s26, 2  ;;  %p161_p1 = scmp.ne.s32.totalorder %s831_s20, %s827_s19 }
   0x7   : > { %p162_p2 = scmp.eq.s32.totalorder %s629_s24, 1  ;;  %p167_p3 = scmp.ne.s32.totalorder %s827_s19, %s823_s18 }
   0x8   : > { %s1084_s26 = smov (%p32_p0, %s30_s26), 0  ;;  %p168_p5 = scmp.eq.s32.totalorder %s630_s25, 1 }
   0x9   : > { %p921_p4 = por %p162_p2, %p161_p1  ;;  %s146_s29 = ssub.s32 %s839_s22, %s1084_s26 }
   0xa   : > { %p633_p6 = scmp.ge.s32.totalorder %s843_s23, 1  ;;  %p149_p7 = scmp.eq.s32.totalorder %s146_s29, 0 }
   0xb   : > { %p928_p8 = por %p168_p5, %p167_p3  ;;  %p209_p9 = scmp.lt.s32.totalorder %s843_s23, 3 }
   0xc   : > { %s934_s6 = scalar_select %p149_p7, %s831_s20, %s151_s27  }
   0xd   : > { %p210_p10 = pnand %p633_p6, %p209_p9 }
   0xe   : > { %p240_p11 = scmp.lt.s32.totalorder (!%p210_p10), %s835_s21, 1  ;;  %s237_s24 = sand.u32 (!%p210_p10), 1, %s827_s19  }
   0xf   : > { %213 = sbr.rel (%p210_p10) target bundleno = 462 (0x1ce), region = 40  ;;  %s634_s25 = sshll.u32 (!%p210_p10), %s237_s24, 6 }
  0x10   : > { %s239_s27 = scalar_lea.vmem (!%p210_p10), [#allocation2], %s634_s25  ;;  %s653_s29 = sshll.u32 (!%p210_p10), %s835_s21, 10 }
  0x11   : > { %s551_s7 = sshll.u32 (!%p210_p10), %s239_s27, 4  ;;  %s848_s12 = smov (!%p210_p10), [#allocation2]   ;;  %s1019_s7 = int_to_ptr.vmem [resolvable:$true] %s551_s7 }
  0x12   : > { %s767_s11 = scalar_lea.vmem (!%p210_p10), %s1019_s7, 1024  ;;  %s771_s13 = sshll.u32 (!%p210_p10), %s848_s12, 4  ;;  %s772_s13 = int_to_ptr.vmem [resolvable:$false] %s771_s13 }
  0x13   : > { %p768_p12 = scmp.ne.s32.totalorder (!%p210_p10), %s1019_s7, %s767_s11  ;;  %s773_s14 = scalar_lea.vmem (!%p210_p10), %s772_s13, 2048 }
  0x14   : > { %v845_v0 = vmov 0.0   ;;  %vm846_vm0 = vmmov 0   ;;  %v249_v1 = vld [vmem:[%s1072_s2] sm:$0xf]  ;;  %s241_s9 = scalar_select %p240_p11, %s835_s21, 1  ;;  %v847_v2 = vmov 0  }
  0x15   : > { %672 = vmatprep.subr.mxu0 %v845_v0  ;;  %688 = vmatprep.mubr.msk.f32.mxu0 %vm846_vm0, %v845_v0  ;;  %v258_v3 = vld [vmem:[%s1074_s4] sm:$0xff]  ;;  %v261_v7 = vld [vmem:[%s1074_s4 + $0x18] sm:$0xff]  ;;  %v263_v10 = vld [vmem:[%s1074_s4 + $0x28] sm:$0xff]  ;;  %vm279_vm1 = vcmask 523264   ;;  %vm394_vm2 = vcmask 31744   ;;  %vm419_vm3 = vcmask 1043456   ;;  %p769_p13 = pnand %p768_p12, %p921_p4  ;;  %p774_p1 = scmp.lt.s32.totalorder %s1019_s7, %s772_s13 }
  0x16   : > { %765 = vset.pattern.permute.xlu0 %v847_v2  ;;  %766 = vset.pattern.permute.xlu1 %v847_v2  ;;  %s652_s10 = sshll.u32 %s241_s9, 6  ;;  %v265_v13 = vld [vmem:[%s1074_s4 + $0x38] sm:$0xff]  ;;  %v248_v15 = vld [vmem:[%s1071_s1] sm:$0xf]  ;;  %v259_v17 = vld [vmem:[%s1074_s4 + $0x8] sm:$0xff]  ;;  %s1025_s21 = scalar_lea.sflag [#allocation3], %s237_s24 }
  0x17   : > { %276 = vperm.xlu0 %765, %v249_v1   ;;  %s247_s15 = scalar_lea.vmem %s1070_s0, %s652_s10  ;;  %v250_v16 = vld [vmem:[%s1073_s3] sm:$0xff]  ;;  %361 = vperm.xlu1 %766, %v259_v17   ;;  %v260_v18 = vld [vmem:[%s1074_s4 + $0x10] sm:$0xff]  ;;  %v251_v26 = vld [vmem:[%s1073_s3 + $0x8] sm:$0xff]  ;;  %s1017_s10 = scalar_lea.hbm %s1075_s5, %s653_s29 }
  0x18   : > { %v273_v4 = vld [vmem:[%s247_s15 + $0x38] sm:$0xff]  ;;  %v272_v5 = vld [vmem:[%s247_s15 + $0x30] sm:$0xff]  ;;  %v271_v6 = vld [vmem:[%s247_s15 + $0x28] sm:$0xff]  ;;  %693 = vmatprep.mubr.msk.f32.mxu1 %vm394_vm2, %v250_v16  ;;  %p770_p0 = pneg %p769_p13  ;;  %p775_p2 = scmp.lt.s32.totalorder %s773_s14, %s767_s11 }
  0x19   : > { %673 = vmatpush3.msra.mxu0 %v273_v4  ;;  %v270_v8 = vld [vmem:[%s247_s15 + $0x20] sm:$0xff]  ;;  %v269_v9 = vld [vmem:[%s247_s15 + $0x18] sm:$0xff]  ;;  %v268_v11 = vld [vmem:[%s247_s15 + $0x10] sm:$0xff] }
  0x1a   : > { %674 = vmatprep.subr.mxu0 %v845_v0  ;;  %v267_v12 = vld [vmem:[%s247_s15 + $0x8] sm:$0xff]  ;;  %v266_v14 = vld [vmem:[%s247_s15] sm:$0xff]  ;;  %v264_v20 = vld [vmem:[%s1074_s4 + $0x30] sm:$0xff]  ;;  %p776_p3 = por %p775_p2, %p774_p1 }
  0x1b   : > { %356 = vperm.xlu0 %765, %v258_v3   ;;  %675 = vmatpush3.msra.mxu0 %v272_v5  ;;  %v262_v19 = vld [vmem:[%s1074_s4 + $0x20] sm:$0xff]  ;;  %v252_v27 = vld [vmem:[%s1073_s3 + $0x10] sm:$0xff]  ;;  %v253_v28 = vld [vmem:[%s1073_s3 + $0x18] sm:$0xff] }
  0x1c   : > { %676 = vmatprep.subr.mxu0 %v845_v0  ;;  %366 = vperm.xlu1 %766, %v260_v18   ;;  %v254_v29 = vld [vmem:[%s1073_s3 + $0x20] sm:$0xff]  ;;  %v255_v30 = vld [vmem:[%s1073_s3 + $0x28] sm:$0xff]  ;;  %v256_v31 = vld [vmem:[%s1073_s3 + $0x30] sm:$0xff]  ;;  %p777_p5 = pnand %p776_p3, %p770_p0 }
  0x1d   : > { %677 = vmatpush3.msra.mxu0 %v271_v6  ;;  %v257_v32 = vld [vmem:[%s1073_s3 + $0x38] sm:$0xff] }
  0x1e   : > { %678 = vmatprep.subr.mxu0 %v845_v0 }
  0x1f   : > { %371 = vperm.xlu0 %765, %v261_v7   ;;  %679 = vmatpush3.msra.mxu0 %v270_v8 }
  0x20   : > { %680 = vmatprep.subr.mxu0 %v845_v0  ;;  %376 = vperm.xlu1 %766, %v262_v19  }
  0x21   : > { %681 = vmatpush3.msra.mxu0 %v269_v9 }
  0x22   : > { %682 = vmatprep.subr.mxu0 %v845_v0 }
  0x23   : > { %381 = vperm.xlu0 %765, %v263_v10   ;;  %683 = vmatpush3.msra.mxu0 %v268_v11 }
  0x24   : > { %684 = vmatprep.subr.mxu0 %v845_v0  ;;  %386 = vperm.xlu1 %766, %v264_v20  }
  0x25   : > { %685 = vmatpush3.msra.mxu0 %v267_v12 }
  0x26   : > { %686 = vmatprep.subr.mxu0 %v845_v0 }
  0x27   : > { %391 = vperm.xlu0 %765, %v265_v13   ;;  %687 = vmatpush3.msra.mxu0 %v266_v14 }
  0x28   : > { %689 = vmatmul.mubr.msk.f32.vlgmr.msra.gmra.mxu0 %vm279_vm1, %v248_v15 }
  0x92   : > { %v277_v21 = vpop.permute.xlu0 %276  ;;  %v362_v34 = vpop.permute.xlu1 %361 }
  0x96   : > { %v357_v33 = vpop.permute.xlu0 %356 }
  0x97   : > { %v367_v38 = vpop.permute.xlu1 %366 }
  0x9a   : > { %v372_v35 = vpop.permute.xlu0 %371 }
  0x9b   : > { %v377_v46 = vpop.permute.xlu1 %376 }
  0x9e   : > { %v382_v43 = vpop.permute.xlu0 %381 }
  0x9f   : > { %v387_v54 = vpop.permute.xlu1 %386 }
  0xa2   : > { %v392_v51 = vpop.permute.xlu0 %391 }
  0xe8   : > { %v349_v22 = vpop.f32.mrf.mxu0 }
  0xe9   : > { %v350_v23 = vadd.f32 %v349_v22, %v277_v21 }
  0xea   : > { %v690_v24 = vpop.f32.mrf.mxu0 }
  0xeb   : > { %v353_v25 = vmax.f32 %v350_v23, 0.0 }
  0xed   : > { %691 = vmatprep.subr.msk.mxu1 %vm419_vm3, %v353_v25 }
  0xee   : > { %692 = vmatpush3.msk.msra.mxu1 %vm419_vm3, %v353_v25 }
  0xef   : > { %694 = vmatmul.mubr.msk.f32.vlgmr.msra.gmra.mxu1 %vm394_vm2, %v251_v26 }
  0xf0   : > { %696 = vmatprep.mubr.msk.f32.mxu1 %vm394_vm2, %v252_v27 }
  0xf3   : > { %697 = vmatmul.mubr.msk.f32.gmra.mxu1 %vm394_vm2, %v253_v28 }
  0xf4   : > { %699 = vmatprep.mubr.msk.f32.mxu1 %vm394_vm2, %v254_v29 }
  0xf7   : > { %700 = vmatmul.mubr.msk.f32.gmra.mxu1 %vm394_vm2, %v255_v30 }
  0xf8   : > { %702 = vmatprep.mubr.msk.f32.mxu1 %vm394_vm2, %v256_v31 }
  0xfb   : > { %703 = vmatmul.mubr.msk.f32.gmra.mxu1 %vm394_vm2, %v257_v32 }
 0x1af   : > { %v695_v36 = vpop.f32.mrf.mxu1 }
 0x1b0   : > { %v495_v37 = vadd.f32 %v695_v36, %v362_v34 }
 0x1b1   : > { %v489_v39 = vpop.f32.mrf.mxu1 }
 0x1b2   : > { %529 = vst.msk [vmem:[%s239_s27 + $0x8] sm:$0xff] %vm279_vm1, %v495_v37  ;;  %v490_v40 = vadd.f32 %v489_v39, %v357_v33 }
 0x1b3   : > { %v698_v41 = vpop.f32.mrf.mxu1 }
 0x1b4   : > { %528 = vst.msk [vmem:[%s239_s27] sm:$0xff] %vm279_vm1, %v490_v40  ;;  %v505_v42 = vadd.f32 %v698_v41, %v372_v35 }
 0x1b5   : > { %v499_v44 = vpop.f32.mrf.mxu1 }
 0x1b6   : > { %531 = vst.msk [vmem:[%s239_s27 + $0x18] sm:$0xff] %vm279_vm1, %v505_v42  ;;  %v500_v45 = vadd.f32 %v499_v44, %v367_v38 }
 0x1b7   : > { %v701_v47 = vpop.f32.mrf.mxu1 }
 0x1b8   : > { %530 = vst.msk [vmem:[%s239_s27 + $0x10] sm:$0xff] %vm279_vm1, %v500_v45  ;;  %v515_v48 = vadd.f32 %v701_v47, %v382_v43 }
 0x1b9   : > { %v509_v49 = vpop.f32.mrf.mxu1 }
 0x1ba   : > { %533 = vst.msk [vmem:[%s239_s27 + $0x28] sm:$0xff] %vm279_vm1, %v515_v48  ;;  %v510_v50 = vadd.f32 %v509_v49, %v377_v46 }
 0x1bb   : > { %v704_v52 = vpop.f32.mrf.mxu1 }
 0x1bc   : > { %532 = vst.msk [vmem:[%s239_s27 + $0x20] sm:$0xff] %vm279_vm1, %v510_v50  ;;  %v525_v53 = vadd.f32 %v704_v52, %v392_v51 }
 0x1bd   : > { %v519_v55 = vpop.f32.mrf.mxu1 }
 0x1be   : > { %535 = vst.msk [vmem:[%s239_s27 + $0x38] sm:$0xff] %vm279_vm1, %v525_v53  ;;  %v520_v56 = vadd.f32 %v519_v55, %v387_v54 }
 0x1c0   : > { %534 = vst.msk [vmem:[%s239_s27 + $0x30] sm:$0xff] %vm279_vm1, %v520_v56 }
 0x1c1   : > { %780 = shalt.err (!%p777_p5)
}
 0x1c2   : > { %s781_s15 = scalar_lea.hbm %s1017_s10, 1024  ;;  %s785_s24 = scalar_lea.hbm %s1075_s5, 2048 }
 0x1c3   : > { %p782_p6 = scmp.ne.s32.totalorder %s1017_s10, %s781_s15  ;;  %p786_p10 = scmp.lt.s32.totalorder %s1017_s10, %s1075_s5 }
 0x1c4   : > { %p787_p11 = scmp.lt.s32.totalorder %s785_s24, %s781_s15 }
 0x1c5   : > { %p783_p7 = pnand %p782_p6, %p921_p4 }
 0x1c6   : > { %p788_p12 = por %p787_p11, %p786_p10 }
 0x1c7   : > { %p784_p9 = pneg %p783_p7 }
 0x1c9   : > { %p789_p13 = pnand %p788_p12, %p784_p9 }
 0x1cb   : > { %792 = shalt.err (!%p789_p13)
}
 0x1cc   : > { %s849_s29 = smov 128   ;;  %s850_s8 = smov 8  }
 0x1cd   : > { %705 = dma.vmem_to_hbm [thread:$0]  (%p921_p4), %s1019_s7, 1024, %s1017_s10, %s1025_s21, %s849_s29, %s849_s29, %s850_s8  }
 0x1ce PF: > { %p711_p0 = scmp.ge.s32.totalorder %s843_s23, 2  ;;  %s566_s9 = sand.u32 1, %s823_s18  }
 0x1cf   : > { %s567_s11 = scalar_lea.sflag [#allocation3], %s566_s9 }
 0x1d0   : > { %p708_p1 = pnand %p711_p0, %p928_p8 }
 0x1d2   : > { %p709_p2 = pneg %p708_p1 }
 0x1d4   : > { %818 = dma.done.wait (%p709_p2), %s567_s11, 1024  }
 0x1d5   : > { %820 = vsyncadd (%p709_p2), %s567_s11, 4294966272  ;;  %s18_s23 = sadd.s32 1, %s843_s23   ;;  %s1078_s18 = smov %s827_s19 }
 0x1d6   : > { %p15_p3 = scmp.ge.s32.totalorder %s18_s23, 4   ;;  %s1079_s19 = smov %s831_s20 }
 0x1d7   : > { %s1080_s20 = smov %s934_s6  ;;  %s1081_s21 = smov %s839_s22 }
 0x1d8   : > { %s1082_s22 = smov %s1084_s26  ;;  %17 = sbr.rel (!%p15_p3) target bundleno = 4 (0x4), region = 75 }
 0x1dd   :  { %572 = vsyncpa [#allocation3], 1 }
 0x1de   :  { %574 = vsyncpa [#allocation3 + $0x1], 1 }

</bundles_post_ra>
